<compile_context>
chip_gen: v5e
topology: v5e:2x2
jax: 0.10.0
libtpu: 0.0.40
codegen_flags: <defaults>
</compile_context>

<pallas_src>
import functools
import math

import jax
import jax.numpy as jnp
from jax import lax
from jax.experimental import pallas as pl
from jax.experimental.pallas import tpu as pltpu


# ----------------------------------------------------------------------------
# helpers
# ----------------------------------------------------------------------------
def _round_up(x, m):
    return ((x + m - 1) // m) * m


def _pick_block(dim, target, align):
    """Largest tile <= target that is a multiple of `align` and divides dim,
    falling back to the full dimension (always a legal block)."""
    if dim <= target:
        return dim
    t = max(align, (target // align) * align)
    while t >= align:
        if dim % t == 0:
            return t
        t -= align
    return dim


def _tile_and_pad(dim, target, align):
    """Return (padded_dim, tile) with tile | padded_dim and aligned tiles.

    Guards against the full-dim fallback producing huge, misaligned tiles for
    odd sequence lengths (review opt: pad instead of falling back)."""
    if dim <= align:
        return dim, dim                     # full-dim block is always legal
    if dim <= target:
        pd = _round_up(dim, align)
        return pd, pd
    t = max(align, (target // align) * align)
    pd = _round_up(dim, t)
    return pd, t


def _head_group(num_heads, d_k):
    """G = largest divisor of H that is <= max(1, 128 // d_k)."""
    target = max(1, 128 // max(d_k, 1))
    g = 1
    for cand in range(1, num_heads + 1):
        if num_heads % cand == 0 and cand <= target:
            g = cand
    return g


def _compiler_params(semantics, est_bytes):
    """Generation-aware VMEM budget (v7x has 64 MiB/TC vs 128 MiB on v5e/v6e)."""
    try:
        cap = int(pltpu.get_tpu_info().vmem_capacity_bytes)
    except Exception:  # pragma: no cover - conservative fallback
        cap = 64 << 20
    hi = (cap * 3) // 4
    limit = int(min(hi, max(32 << 20, 2 * est_bytes)))
    limit = max(limit, 16 << 20)
    return pltpu.CompilerParams(dimension_semantics=semantics,
                                vmem_limit_bytes=limit)


# ----------------------------------------------------------------------------
# linear (no-bias) projection kernel:  out = x @ W
# ----------------------------------------------------------------------------
def _linear_kernel(x_ref, w_ref, o_ref):
    o_ref[...] = jnp.dot(x_ref[...], w_ref[...],
                         preferred_element_type=jnp.float32).astype(o_ref.dtype)


def _linear_nobias(x, w, *, out_dtype, tm_target=512, tn_target=1024):
    M, K = x.shape
    K2, N = w.shape
    assert K == K2
    tm = _pick_block(M, tm_target, 8)
    tn = _pick_block(N, tn_target, 128)
    assert M % tm == 0 and N % tn == 0

    itm = x.dtype.itemsize
    est = 2 * (tm * K * itm + K * tn * w.dtype.itemsize
               + tm * tn * jnp.dtype(out_dtype).itemsize)

    # Weight-column axis j is the OUTER grid axis -> each weight tile is DMA'd
    # once; the x row tile is re-streamed N/tn times (small for typical D).
    return pl.pallas_call(
        _linear_kernel,
        out_shape=jax.ShapeDtypeStruct((M, N), out_dtype),
        grid_spec=pltpu.PrefetchScalarGridSpec(
            num_scalar_prefetch=0,
            grid=(N // tn, M // tm),
            in_specs=[pl.BlockSpec((tm, K), lambda j, i: (i, 0)),
                      pl.BlockSpec((K, tn), lambda j, i: (0, j))],
            out_specs=pl.BlockSpec((tm, tn), lambda j, i: (i, j)),
        ),
        compiler_params=_compiler_params(("parallel", "parallel"), est),
    )(x, w)


# ----------------------------------------------------------------------------
# flash-attention kernel (online softmax over kv blocks, G heads per step)
# ----------------------------------------------------------------------------
def _flash_kernel(q_ref, k_ref, v_ref, mask_ref, o_ref, m_sc, l_sc, acc_sc):
    ki = pl.program_id(3)

    @pl.when(ki == 0)
    def _():
        m_sc[...] = jnp.full_like(m_sc, -jnp.inf)
        l_sc[...] = jnp.zeros_like(l_sc)
        acc_sc[...] = jnp.zeros_like(acc_sc)

    q = q_ref[...]                                   # (G, tq, d_k)  (scale folded into W_q)
    k = k_ref[...]                                   # (G, tkv, d_k)
    v = v_ref[...]                                   # (G, tkv, d_k)

    # Batched QK^T per head group; MXU accumulates in f32.
    s = jnp.einsum('gqd,gkd->gqk', q, k,
                   preferred_element_type=jnp.float32)        # (G, tq, tkv)
    keep = (mask_ref[...] != 0)                               # (tq, tkv) int8 mask
    s = jnp.where(keep[None, :, :], s, jnp.float32(-1e9))

    m_prev = m_sc[...]
    m_new = jnp.maximum(m_prev, jnp.max(s, axis=-1, keepdims=True))
    alpha = jnp.exp(m_prev - m_new)
    p = jnp.exp(s - m_new)
    l_sc[...] = alpha * l_sc[...] + jnp.sum(p, axis=-1, keepdims=True)
    acc_sc[...] = alpha * acc_sc[...] + jnp.einsum(
        'gqk,gkd->gqd', p.astype(v.dtype), v, preferred_element_type=jnp.float32)
    m_sc[...] = m_new

    @pl.when(ki == pl.num_programs(3) - 1)
    def _():
        o_ref[...] = (acc_sc[...] *
                      pl.reciprocal(l_sc[...], approx=True)).astype(o_ref.dtype)


def _flash_attention(q, k, v, mask_i8, *, tq, tkv, G):
    """q: (B, H, Sq, d_k); k, v: (B, H, Skv, d_k); mask_i8: (B, Sq, Skv)."""
    B, H, Sq, d_k = q.shape
    Skv = k.shape[2]
    assert Sq % tq == 0 and Skv % tkv == 0 and H % G == 0
    n_q, n_kv, nhg = Sq // tq, Skv // tkv, H // G

    act = q.dtype.itemsize
    est = 2 * ((2 * G * tq * d_k + 2 * G * tkv * d_k) * act + tq * tkv)  # i/o tiles
    est += (2 * G * tq + G * tq * d_k) * 4                               # f32 scratch
    est += 2 * G * tq * tkv * 4                                          # f32 s/p temps

    q_spec = pl.BlockSpec((None, G, tq, d_k), lambda b, hg, qi, ki: (b, hg, qi, 0))
    kv_spec = pl.BlockSpec((None, G, tkv, d_k), lambda b, hg, qi, ki: (b, hg, ki, 0))
    mask_spec = pl.BlockSpec((None, tq, tkv), lambda b, hg, qi, ki: (b, qi, ki))
    o_spec = pl.BlockSpec((None, G, tq, d_k), lambda b, hg, qi, ki: (b, hg, qi, 0))

    return pl.pallas_call(
        _flash_kernel,
        out_shape=jax.ShapeDtypeStruct((B, H, Sq, d_k), q.dtype),
        grid_spec=pltpu.PrefetchScalarGridSpec(
            num_scalar_prefetch=0,
            grid=(B, nhg, n_q, n_kv),
            in_specs=[q_spec, kv_spec, kv_spec, mask_spec],
            out_specs=o_spec,
            scratch_shapes=[pltpu.VMEM((G, tq, 1), jnp.float32),      # running max
                            pltpu.VMEM((G, tq, 1), jnp.float32),      # running sum
                            pltpu.VMEM((G, tq, d_k), jnp.float32)],   # accumulator
        ),
        compiler_params=_compiler_params(
            ("parallel", "parallel", "parallel", "arbitrary"), est),
    )(q, k, v, mask_i8)


# ----------------------------------------------------------------------------
# fused head-merge + output projection:
#   out[b, s, :] = sum_h attn[b, h, s, :] @ W_o[h*d_k:(h+1)*d_k, :]
# ----------------------------------------------------------------------------
def _merge_proj_kernel(x_ref, w_ref, o_ref, acc_ref):
    h = pl.program_id(2)

    @pl.when(h == 0)
    def _():
        acc_ref[...] = jnp.zeros_like(acc_ref)

    acc_ref[...] += jnp.dot(x_ref[...], w_ref[h],
                            preferred_element_type=jnp.float32)

    @pl.when(h == pl.num_programs(2) - 1)
    def _():
        o_ref[...] = acc_ref[...].astype(o_ref.dtype)


def _merge_out_proj(attn, wo3, *, out_dtype, tm_target=512):
    """attn: (B, H, S, d_k); wo3: (H, d_k, D) (free reshape of (D, D) W_o)."""
    B, H, S, d_k = attn.shape
    D = wo3.shape[-1]
    tm = _pick_block(S, tm_target, 8)
    assert S % tm == 0

    est = (2 * tm * d_k * attn.dtype.itemsize
           + H * d_k * D * wo3.dtype.itemsize
           + 2 * tm * D * jnp.dtype(out_dtype).itemsize
           + tm * D * 4)

    return pl.pallas_call(
        _merge_proj_kernel,
        out_shape=jax.ShapeDtypeStruct((B, S, D), out_dtype),
        grid_spec=pltpu.PrefetchScalarGridSpec(
            num_scalar_prefetch=0,
            grid=(B, S // tm, H),
            in_specs=[pl.BlockSpec((None, None, tm, d_k),
                                   lambda b, si, h: (b, h, si, 0)),
                      # whole W_o resident once in VMEM (constant index map)
                      pl.BlockSpec((H, d_k, D), lambda b, si, h: (0, 0, 0))],
            out_specs=pl.BlockSpec((None, tm, D), lambda b, si, h: (b, si, 0)),
            scratch_shapes=[pltpu.VMEM((tm, D), jnp.float32)],
        ),
        compiler_params=_compiler_params(("parallel", "parallel", "arbitrary"), est),
    )(attn, wo3)


# ----------------------------------------------------------------------------
# full MultiHeadAttentionBlock forward
# ----------------------------------------------------------------------------
def multi_head_attention(q, k, v, mask, wq_t, wk_t, wv_t, wo_t, *, num_heads,
                         out_dtype=None, q_block=512, kv_block=1024):
    """q: (B, Sq, D); k, v: (B, Skv, D); mask broadcastable to (B, 1, Sq, Skv)
    with 1 = keep.  w*_t: (D_in, D_out) pre-transposed nn.Linear weights."""
    B, Sq, D = q.shape
    _, Skv, _ = k.shape
    assert D % num_heads == 0
    d_k = D // num_heads
    act_dtype = q.dtype
    out_dtype = act_dtype if out_dtype is None else out_dtype

    # ---- attention tiling (head grouping + padded sequence lengths) --------
    G = _head_group(num_heads, d_k)
    Sq_pad, tq = _tile_and_pad(Sq, q_block, 8)
    kv_target = kv_block
    while kv_target > 128 and G * tq * kv_target * 8 > (12 << 20):
        kv_target //= 2                    # bound the f32 (G,tq,tkv) softmax temps
    Skv_pad, tkv = _tile_and_pad(Skv, kv_target, 128)

    # ---- int8 mask (1 = keep); padded kv columns are masked out ------------
    mask_i8 = jnp.broadcast_to((mask != 0), (B, 1, Sq, Skv)) \
                 .astype(jnp.int8).reshape(B, Sq, Skv)
    if Sq_pad != Sq or Skv_pad != Skv:
        mask_i8 = jnp.pad(mask_i8, ((0, 0), (0, Sq_pad - Sq), (0, Skv_pad - Skv)))

    q_in, k_in, v_in = q, k, v
    fuse_qkv = (q_in is k_in) and (k_in is v_in) and (Sq_pad == Sq) and (Skv_pad == Skv)
    if Sq_pad != Sq:
        q_in = jnp.pad(q_in, ((0, 0), (0, Sq_pad - Sq), (0, 0)))
    if Skv_pad != Skv:
        k_in = jnp.pad(k_in, ((0, 0), (0, Skv_pad - Skv), (0, 0)))
        v_in = jnp.pad(v_in, ((0, 0), (0, Skv_pad - Skv), (0, 0)))

    # ---- projections: fold 1/sqrt(d_k) into W_q; fuse QKV for self-attn ----
    sm_scale = 1.0 / math.sqrt(d_k)
    wq_s = (wq_t.astype(jnp.float32) * sm_scale).astype(wq_t.dtype)

    if fuse_qkv:
        w_qkv = jnp.concatenate([wq_s, wk_t, wv_t], axis=1)          # (D, 3D)
        qkv = _linear_nobias(q_in.reshape(B * Sq_pad, D), w_qkv, out_dtype=act_dtype)
        q_p, k_p, v_p = qkv[:, :D], qkv[:, D:2 * D], qkv[:, 2 * D:]
    else:
        q_p = _linear_nobias(q_in.reshape(B * Sq_pad, D), wq_s, out_dtype=act_dtype)
        k_p = _linear_nobias(k_in.reshape(B * Skv_pad, D), wk_t, out_dtype=act_dtype)
        v_p = _linear_nobias(v_in.reshape(B * Skv_pad, D), wv_t, out_dtype=act_dtype)

    # ---- head split (XLA transpose, see TODO at top) ------------------------
    q_h = q_p.reshape(B, Sq_pad, num_heads, d_k).transpose(0, 2, 1, 3)
    k_h = k_p.reshape(B, Skv_pad, num_heads, d_k).transpose(0, 2, 1, 3)
    v_h = v_p.reshape(B, Skv_pad, num_heads, d_k).transpose(0, 2, 1, 3)

    # ---- flash attention core -----------------------------------------------
    attn = _flash_attention(q_h, k_h, v_h, mask_i8, tq=tq, tkv=tkv, G=G)

    # ---- head merge + output projection (fused; no XLA merge transpose) -----
    if D * D * wo_t.dtype.itemsize <= (8 << 20):
        wo3 = wo_t.reshape(num_heads, d_k, D)                        # free reshape
        out = _merge_out_proj(attn, wo3, out_dtype=out_dtype)        # (B, Sq_pad, D)
    else:
        # very large D: keeping W_o resident would not fit v7x VMEM -> fall back
        x = attn.transpose(0, 2, 1, 3).reshape(B * Sq_pad, D)
        out = _linear_nobias(x, wo_t, out_dtype=out_dtype).reshape(B, Sq_pad, D)

    return out[:, :Sq, :]


# ----------------------------------------------------------------------------
# pure-JAX reference (f32) for the correctness check
# ----------------------------------------------------------------------------
def _reference(q, k, v, mask, wq_t, wk_t, wv_t, wo_t, num_heads):
    f32 = jnp.float32
    q32, k32, v32 = q.astype(f32), k.astype(f32), v.astype(f32)
    wq, wk, wv, wo = (w.astype(f32) for w in (wq_t, wk_t, wv_t, wo_t))
    B, Sq, D = q.shape
    Skv = k.shape[1]
    d_k = D // num_heads
    query = (q32 @ wq).reshape(B, Sq, num_heads, d_k).transpose(0, 2, 1, 3)
    key = (k32 @ wk).reshape(B, Skv, num_heads, d_k).transpose(0, 2, 1, 3)
    value = (v32 @ wv).reshape(B, Skv, num_heads, d_k).transpose(0, 2, 1, 3)
    scores = (query @ key.transpose(0, 1, 3, 2)) / math.sqrt(d_k)
    scores = jnp.where(mask == 0, -1e9, scores)
    attn = jax.nn.softmax(scores, axis=-1)
    x = (attn @ value).transpose(0, 2, 1, 3).reshape(B, Sq, D)
    return x @ wo


if __name__ == "__main__":
    B, Sq, Skv, d_model, h = 2, 8, 16, 32, 4          # d_k = 8
    key0 = jax.random.PRNGKey(0)
    kq, kk, kv, kx, kwq, kwk, kwv, kwo = jax.random.split(key0, 8)

    act_dtype = jnp.bfloat16                           # bf16 operands, f32 MXU acc
    bound = 1.0 / math.sqrt(d_model)                   # nn.Linear default init

    def init_w(rng):
        return jax.random.uniform(rng, (d_model, d_model), minval=-bound,
                                  maxval=bound, dtype=jnp.float32).astype(act_dtype)

    wq_t, wk_t, wv_t, wo_t = init_w(kwq), init_w(kwk), init_w(kwv), init_w(kwo)

    # --- test 1: cross-attention (distinct q/k/v, Sq != Skv, padding mask) ---
    q = jax.random.normal(kq, (B, Sq, d_model), dtype=jnp.float32).astype(act_dtype)
    k = jax.random.normal(kk, (B, Skv, d_model), dtype=jnp.float32).astype(act_dtype)
    v = jax.random.normal(kv, (B, Skv, d_model), dtype=jnp.float32).astype(act_dtype)
    lens = jnp.array([Skv, 11]).reshape(B, 1, 1, 1)
    mask = (jnp.arange(Skv)[None, None, None, :] < lens).astype(jnp.float32)

    out1 = multi_head_attention(q, k, v, mask, wq_t, wk_t, wv_t, wo_t, num_heads=h)
    out1 = jax.block_until_ready(out1)
    ref1 = _reference(q, k, v, mask, wq_t, wk_t, wv_t, wo_t, h)
    assert out1.shape == (B, Sq, d_model)
    err1 = jnp.max(jnp.abs(out1.astype(jnp.float32) - ref1))
    assert jnp.allclose(out1.astype(jnp.float32), ref1, atol=4e-2, rtol=4e-2), \
        f"cross-attn max abs err {err1}"

    # --- test 2: self-attention (fused QKV path, causal mask) ----------------
    x = jax.random.normal(kx, (B, Sq, d_model), dtype=jnp.float32).astype(act_dtype)
    causal = jnp.tril(jnp.ones((Sq, Sq), dtype=jnp.float32))[None, None]
    out2 = multi_head_attention(x, x, x, causal, wq_t, wk_t, wv_t, wo_t, num_heads=h)
    out2 = jax.block_until_ready(out2)
    ref2 = _reference(x, x, x, causal, wq_t, wk_t, wv_t, wo_t, h)
    err2 = jnp.max(jnp.abs(out2.astype(jnp.float32) - ref2))
    assert jnp.allclose(out2.astype(jnp.float32), ref2, atol=4e-2, rtol=4e-2), \
        f"self-attn max abs err {err2}"

    print("KERNEL_OK")
</pallas_src>

<mosaic_0001>
module attributes {stable_mosaic.version = 11 : i64} {
  func.func @_linear_kernel(%arg0: i32, %arg1: i32, %arg2: memref<16x32xbf16, #tpu.memory_space<vmem>>, %arg3: memref<32x32xbf16, #tpu.memory_space<vmem>>, %arg4: memref<16x32xbf16, #tpu.memory_space<vmem>>) attributes {dimension_semantics = [#tpu.dimension_semantics<parallel>, #tpu.dimension_semantics<parallel>], iteration_bounds = array<i64: 1, 1>, scalar_prefetch = 0 : i64, scratch_operands = 0 : i64, tpu.core_type = #tpu.core_type<tc>, window_params = [{transform_indices = @transform_0, window_bounds = array<i64: 16, 32>}, {transform_indices = @transform_1, window_bounds = array<i64: 32, 32>}, {transform_indices = @transform_2, window_bounds = array<i64: 16, 32>}]} {
    %c0 = arith.constant 0 : index
    %c0_0 = arith.constant 0 : index
    %0 = vector.load %arg2[%c0, %c0_0] : memref<16x32xbf16, #tpu.memory_space<vmem>>, vector<16x32xbf16>
    %c0_1 = arith.constant 0 : index
    %c0_2 = arith.constant 0 : index
    %1 = vector.load %arg3[%c0_1, %c0_2] : memref<32x32xbf16, #tpu.memory_space<vmem>>, vector<32x32xbf16>
    %cst = arith.constant dense<0.000000e+00> : vector<16x32xf32>
    %2 = tpu.matmul %0, %1, %cst {dimension_numbers = #tpu.dot_dimension_numbers<[1], [0], [0], [1], [0, 0, 1, 1], [], []>} : vector<16x32xbf16>, vector<32x32xbf16>, vector<16x32xf32> -> vector<16x32xf32>
    %3 = arith.truncf %2 : vector<16x32xf32> to vector<16x32xbf16>
    %c0_3 = arith.constant 0 : index
    %c0_4 = arith.constant 0 : index
    %4 = vector.load %arg4[%c0_3, %c0_4] : memref<16x32xbf16, #tpu.memory_space<vmem>>, vector<16x32xbf16>
    tpu.vector_store %arg4[%c0_3, %c0_4], %3 {strides = array<i32>} : memref<16x32xbf16, #tpu.memory_space<vmem>>, vector<16x32xbf16>,
    return
  }
  func.func @transform_0(%arg0: i32, %arg1: i32) -> (i32, i32) {
    %c0_i32 = arith.constant 0 : i32
    %c0_i32_0 = arith.constant 0 : i32
    return %arg1, %c0_i32 : i32, i32
  }
  func.func @transform_1(%arg0: i32, %arg1: i32) -> (i32, i32) {
    %c0_i32 = arith.constant 0 : i32
    %c0_i32_0 = arith.constant 0 : i32
    return %c0_i32, %arg0 : i32, i32
  }
  func.func @transform_2(%arg0: i32, %arg1: i32) -> (i32, i32) {
    %c0_i32 = arith.constant 0 : i32
    return %arg1, %arg0 : i32, i32
  }
}

</mosaic_0001>

<bundles_post_ra>
// kernel: tpu_custom_call.1
= control target key start
LH: loop header
LB: loop body
LE: loop exit
PB: predicated region body
PF: predicated region fallthrough
CT: control target
= control target key end

     0   :  { %7 = vsyncpa [#allocation3], 0  ;;  %s248_s0 = inlined_call_operand.hbm [shape: bf16[16,32], index: 0, kind: input, shape index: {}]   ;;  %s249_s1 = inlined_call_operand.hbm [shape: bf16[32,32], index: 1, kind: input, shape index: {}]   ;;  %s250_s2 = inlined_call_operand.hbm [shape: bf16[16,32], index: 2, kind: output, shape index: {}]  }
   0x1   :  { %8 = vsyncpa [#allocation6], 0 }
   0x2   :  { %9 = vsyncpa [#allocation4], 0  ;;  %s14_s11 = sshll.u32 %s248_s0, 4  ;;  %s210_s12 = smov [#allocation2]   ;;  %s15_s11 = int_to_ptr.hbm [resolvable:$true] %s14_s11 }
   0x3   :  { %s16_s13 = sshll.u32 %s210_s12, 4  ;;  %s27_s16 = sshll.u32 %s249_s1, 4  ;;  %s17_s13 = int_to_ptr.vmem [resolvable:$true] %s16_s13  ;;  %s28_s16 = int_to_ptr.hbm [resolvable:$true] %s27_s16 }
   0x4   :  { %s211_s17 = smov 64   ;;  %s212_s18 = smov 4  }
   0x5   :  { %22 = dma.hbm_to_vmem [thread:$0]  %s15_s11, 128, %s17_s13, [#allocation3], %s211_s17, %s211_s17, %s212_s18  }
   0x6   :  { %s213_s19 = smov [#allocation5]  }
   0x7   :  { %s29_s20 = sshll.u32 %s213_s19, 4  ;;  %s30_s20 = int_to_ptr.vmem [resolvable:$true] %s29_s20 }
   0x8   :  { %35 = dma.hbm_to_vmem [thread:$0]  %s28_s16, 256, %s30_s20, [#allocation6], %s211_s17, %s211_s17, %s212_s18  }
   0x9   :  { %204 = dma.done.wait [#allocation3], 128  }
   0xa   :  { %205 = vsyncadd [#allocation3], 4294967168 }
   0xb   :  { %206 = dma.done.wait [#allocation6], 256  }
   0xc   :  { %207 = vsyncadd [#allocation6], 4294967040  ;;  %v126_v0 = vld [vmem:[#allocation5 + $0x8] sm:$0xff]  ;;  %v125_v1 = vld [vmem:[#allocation5] sm:$0xff]  ;;  %vm68_vm0 = vcmask 261120   ;;  %vm88_vm1 = vcmask 257024  }
   0xd   :  { %78 = vmatpush.bf16.msra.mxu0 %v126_v0  ;;  %v124_v2 = vld [vmem:[#allocation2] sm:$0xff]  ;;  %s214_s0 = smov [#allocation7]   ;;  %s97_s23 = sshll.u32 %s250_s2, 4  ;;  %s98_s23 = int_to_ptr.hbm [resolvable:$true] %s97_s23 }
   0xe   :  { %s95_s1 = sshll.u32 %s214_s0, 4  ;;  %s96_s1 = int_to_ptr.vmem [resolvable:$true] %s95_s1 }
  0x11   :  { %79 = vmatpush.bf16.msra.mxu0 %v125_v1 }
  0x14   :  { %123 = vmatmul.msk.bf16.vlgmr.msra.gmra.mxu0 %vm68_vm0, %v124_v2 }
  0x91   :  { %v81_v3 = vpop.f32.mrf.mxu0 }
  0x92   :  { %v86_v4 = vpack.c.bf16 %v81_v3, %v81_v3 }
  0x94   :  { %89 = vst.msk [vmem:[#allocation7] sm:$0xf] %vm88_vm1, %v86_v4 }
  0x99   :  { %v83_v5 = vpop.f32.mrf.mxu0 }
  0x9a   :  { %v87_v6 = vpack.c.bf16 %v83_v5, %v83_v5 }
  0x9c   :  { %90 = vst.msk [vmem:[#allocation7 + $0x4] sm:$0xf] %vm88_vm1, %v87_v6 }
  0x9d   :  { %103 = dma.vmem_to_hbm [thread:$0]  %s96_s1, 128, %s98_s23, [#allocation4], %s211_s17, %s211_s17, %s212_s18  }
  0x9e   :  { %208 = dma.done.wait [#allocation4], 128  }
  0x9f   :  { %209 = vsyncadd [#allocation4], 4294967168 }
  0xa0   :  { %108 = vsyncpa [#allocation3], 1 }
  0xa1   :  { %109 = vsyncpa [#allocation6], 1 }
  0xa2   :  { %110 = vsyncpa [#allocation4], 1 }

</bundles_post_ra>
